<compile_context>
chip_gen: v5e
topology: v5e:2x2
jax: 0.10.0
libtpu: 0.0.40
codegen_flags: <defaults>
</compile_context>

<pallas_src>
import functools

import jax
import jax.numpy as jnp
from jax import lax
from jax.experimental import pallas as pl
from jax.experimental.pallas import tpu as pltpu


def _mixup_ce_kernel(lam_ref, logits_ref, labels_ref, out_ref, *, n_total, tile_n):
    """Per-tile partial sum of lam*CE_row(y1) + (1-lam)*CE_row(y2) over valid rows.

    lam_ref:    (1, 1)      f32 in SMEM
    logits_ref: (tile_n, C) input dtype in VMEM
    labels_ref: (tile_n, 2) i32 in VMEM (y1 in column 0, y2 in column 1)
    out_ref:    (8, 128)    f32 in VMEM -- tile partial, broadcast lane-dense
    """
    i = pl.program_id(0)
    tn, c = logits_ref.shape

    # ---- Pass 1: row-wise numerically-stable log-sum-exp in f32.
    # The f32 upcast is only needed for this pass; the gather pass below re-reads the
    # tile in its native dtype, so this temporary does not stay live across the body.
    x32 = logits_ref[...].astype(jnp.float32)                     # (tile_n, C)
    m = jnp.max(x32, axis=-1, keepdims=True)                      # (tile_n, 1)
    lse = m + jnp.log(jnp.sum(jnp.exp(x32 - m), axis=-1, keepdims=True))

    # ---- Pass 2: two masked row-gathers in the *native* dtype.
    # Each row selects exactly one element, so summing zeros + one value is exact even
    # in bf16; lam is folded in after the (tile_n, C) -> (tile_n, 1) reductions, which
    # removes one full-tile mul and one full-tile add from the VALU path.
    # NOTE: out-of-range labels (y < 0 or y >= C) silently contribute 0 instead of
    # raising like PyTorch's CrossEntropyLoss.
    x = logits_ref[...]                                           # native dtype
    col = lax.broadcasted_iota(jnp.int32, (tn, c), 1)
    y1 = labels_ref[:, 0:1]                                       # (tile_n, 1)
    y2 = labels_ref[:, 1:2]                                       # (tile_n, 1)
    zero = jnp.zeros((), dtype=x.dtype)
    p1 = jnp.sum(jnp.where(col == y1, x, zero), axis=-1, keepdims=True).astype(jnp.float32)
    p2 = jnp.sum(jnp.where(col == y2, x, zero), axis=-1, keepdims=True).astype(jnp.float32)
    lam = lam_ref[0, 0]
    picked = lam * p1 + (1.0 - lam) * p2                          # (tile_n, 1) f32

    # Mask padding rows of the last (partial) tile against the *global* batch size.
    # jnp.where is a select, so Inf/NaN produced by garbage rows cannot propagate.
    row = lax.broadcasted_iota(jnp.int32, (tn, 1), 0) + i * tile_n
    term = jnp.where(row < n_total, lse - picked, 0.0)            # (tile_n, 1)
    partial = jnp.sum(term)                                       # scalar

    # Lane-dense, (8,128)-aligned per-tile output block (distinct block per grid step
    # -> the batch axis can be sharded across TensorCores on multi-core chips).
    out_ref[...] = jnp.broadcast_to(partial, out_ref.shape).astype(jnp.float32)


def _sublane_align(itemsize):
    # Packed sublane tiling: f32 -> (8,128), bf16/f16 -> (16,128), 1-byte -> (32,128).
    return {4: 8, 2: 16, 1: 32}.get(itemsize, 8)


# Total per-grid-step VMEM budget for pipelined buffers + in-kernel f32 temporaries.
# ~24 MiB keeps the computed vmem_limit under ~40 MiB, safe on every generation
# (v5e/v6e 128 MiB physical, v7x 64 MiB physical).
_VMEM_BUDGET_BYTES = 24 * 1024 * 1024


def _per_row_vmem_bytes(c, itemsize):
    return (
        2 * c * itemsize        # double-buffered logits tile rows
        + 3 * c * 4             # conservative in-kernel f32 temporaries
        + 2 * 128 * 4           # double-buffered (row, 2) i32 labels, lane-padded to 128
    )


def _choose_tile_n(n, c, itemsize):
    """Batch tile: as large as the VMEM budget allows, dtype-aligned, >= 2 grid steps."""
    align = _sublane_align(itemsize)
    if n <= 2 * align:
        return n                                    # single full-extent block
    tile = _VMEM_BUDGET_BYTES // _per_row_vmem_bytes(c, itemsize)
    tile = min(tile, -(-n // 2))                    # guarantee >= 2 tiles (v7x megacore)
    tile = max(align, (tile // align) * align)
    return min(tile, n)


def _vmem_limit_bytes(tile_n, c, itemsize):
    usage = (
        2 * tile_n * c * itemsize     # double-buffered logits tiles
        + 2 * tile_n * 128 * 4        # double-buffered lane-padded label tiles
        + 3 * tile_n * c * 4          # in-kernel f32 temporaries (worst case)
        + 2 * 8 * 128 * 4             # double-buffered (8,128) partial-sum output
    )
    limit = int(usage * 1.25) + (2 << 20)
    return max(16 << 20, min(limit, 48 << 20))


def mixup_loss(output, y1, y2, lam):
    """output: (N, C) float logits (any float dtype); y1, y2: (N,) int labels; lam: scalar."""
    n, c = output.shape
    itemsize = output.dtype.itemsize
    tile_n = _choose_tile_n(n, c, itemsize)
    num_tiles = pl.cdiv(n, tile_n)

    lam_arr = jnp.asarray(lam, dtype=jnp.float32).reshape(1, 1)
    # Pack both label vectors into one (N, 2) i32 array: one DMA stream and one
    # lane-padded VMEM buffer instead of two.
    labels = jnp.stack([y1.astype(jnp.int32), y2.astype(jnp.int32)], axis=-1)

    cost = pl.CostEstimate(
        flops=12 * n * c,                         # ~12 VPU ops/element (LSE + 2 gathers)
        transcendentals=n * c + n,                # exp per element + log per row
        bytes_accessed=n * c * itemsize + n * 2 * 4 + num_tiles * 8 * 128 * 4 + 4,
    )

    partial_tiles = pl.pallas_call(
        functools.partial(_mixup_ce_kernel, n_total=n, tile_n=tile_n),
        out_shape=jax.ShapeDtypeStruct((num_tiles * 8, 128), jnp.float32),
        grid=(num_tiles,),
        in_specs=[
            pl.BlockSpec(memory_space=pltpu.MemorySpace.SMEM),    # lam (whole, SMEM)
            pl.BlockSpec((tile_n, c), lambda i: (i, 0)),          # logits tile (orig dtype)
            pl.BlockSpec((tile_n, 2), lambda i: (i, 0)),          # packed labels tile
        ],
        out_specs=pl.BlockSpec((8, 128), lambda i: (i, 0)),
        compiler_params=pltpu.CompilerParams(
            dimension_semantics=("parallel",),
            vmem_limit_bytes=_vmem_limit_bytes(tile_n, c, itemsize),
        ),
        cost_estimate=cost,
    )(lam_arr, output, labels)

    # Tiny final reduction: one scalar per tile, divide by the *global* N.
    partials = partial_tiles[::8, 0]                              # (num_tiles,)
    return jnp.sum(partials) / n


def _reference(output, y1, y2, lam):
    logp = jax.nn.log_softmax(output.astype(jnp.float32), axis=-1)
    ce1 = -jnp.mean(jnp.take_along_axis(logp, y1[:, None], axis=-1))
    ce2 = -jnp.mean(jnp.take_along_axis(logp, y2[:, None], axis=-1))
    return lam * ce1 + (1.0 - lam) * ce2


if __name__ == "__main__":
    key = jax.random.PRNGKey(0)
    k1, k2, k3 = jax.random.split(key, 3)

    # Case 1: f32 logits, multi-tile grid (tile_n=8, 3 tiles) with a masked partial tile.
    N, C = 20, 32
    out_f32 = jax.random.normal(k1, (N, C), dtype=jnp.float32)
    y1 = jax.random.randint(k2, (N,), 0, C, dtype=jnp.int32)
    y2 = jax.random.randint(k3, (N,), 0, C, dtype=jnp.int32)
    lam = 0.3
    loss = jax.block_until_ready(mixup_loss(out_f32, y1, y2, lam))
    ref = _reference(out_f32, y1, y2, lam)
    assert jnp.allclose(loss, ref, rtol=1e-5, atol=1e-5), (loss, ref)

    # Case 2: bf16 logits (packed-sublane dtype path), 16-row tiles, partial last tile.
    N2, C2 = 33, 40
    k4, k5, k6 = jax.random.split(jax.random.PRNGKey(0), 3)
    out_bf16 = jax.random.normal(k4, (N2, C2), dtype=jnp.float32).astype(jnp.bfloat16)
    y1b = jax.random.randint(k5, (N2,), 0, C2, dtype=jnp.int32)
    y2b = jax.random.randint(k6, (N2,), 0, C2, dtype=jnp.int32)
    loss_b = jax.block_until_ready(mixup_loss(out_bf16, y1b, y2b, 0.7))
    ref_b = _reference(out_bf16, y1b, y2b, 0.7)
    assert jnp.allclose(loss_b, ref_b, rtol=1e-4, atol=1e-4), (loss_b, ref_b)

    print("KERNEL_OK")
</pallas_src>

<mosaic_0001>
module attributes {stable_mosaic.version = 11 : i64} {
  func.func @_mixup_ce_kernel(%arg0: i32, %arg1: memref<1x1xf32, #tpu.memory_space<smem>>, %arg2: memref<8x32xf32, #tpu.memory_space<vmem>>, %arg3: memref<8x2xi32, #tpu.memory_space<vmem>>, %arg4: memref<8x128xf32, #tpu.memory_space<vmem>>) attributes {dimension_semantics = [#tpu.dimension_semantics<parallel>], iteration_bounds = array<i64: 3>, scalar_prefetch = 0 : i64, scratch_operands = 0 : i64, tpu.core_type = #tpu.core_type<tc>, window_params = [{transform_indices = @transform_0, window_bounds = array<i64: 1, 1>}, {transform_indices = @transform_1, window_bounds = array<i64: 8, 32>}, {transform_indices = @transform_2, window_bounds = array<i64: 8, 2>}, {transform_indices = @transform_3, window_bounds = array<i64: 8, 128>}]} {
    %c0 = arith.constant 0 : index
    %c0_0 = arith.constant 0 : index
    %0 = vector.load %arg2[%c0, %c0_0] : memref<8x32xf32, #tpu.memory_space<vmem>>, vector<8x32xf32>
    %cst = arith.constant dense<0xFF800000> : vector<8xf32>
    %1 = vector.multi_reduction <maximumf>, %0, %cst [1] : vector<8x32xf32> to vector<8xf32>
    %2 = vector.shape_cast %1 : vector<8xf32> to vector<8x1xf32>
    %3 = vector.broadcast %2 : vector<8x1xf32> to vector<8x32xf32>
    %4 = arith.subf %0, %3 : vector<8x32xf32>
    %5 = math.exp %4 : vector<8x32xf32>
    %cst_1 = arith.constant dense<0.000000e+00> : vector<8xf32>
    %6 = vector.multi_reduction <add>, %5, %cst_1 [1] : vector<8x32xf32> to vector<8xf32>
    %7 = vector.shape_cast %6 : vector<8xf32> to vector<8x1xf32>
    %8 = math.log %7 : vector<8x1xf32>
    %9 = arith.addf %2, %8 : vector<8x1xf32>
    %c0_2 = arith.constant 0 : index
    %c0_3 = arith.constant 0 : index
    %10 = vector.load %arg2[%c0_2, %c0_3] : memref<8x32xf32, #tpu.memory_space<vmem>>, vector<8x32xf32>
    %11 = tpu.iota {dimensions = array<i32: 1>} : vector<8x32xi32>
    %c0_4 = arith.constant 0 : index
    %c0_5 = arith.constant 0 : index
    %12 = vector.load %arg3[%c0_4, %c0_5] : memref<8x2xi32, #tpu.memory_space<vmem>>, vector<8x1xi32>
    %c0_6 = arith.constant 0 : index
    %c1 = arith.constant 1 : index
    %13 = vector.load %arg3[%c0_6, %c1] : memref<8x2xi32, #tpu.memory_space<vmem>>, vector<8x1xi32>
    %14 = vector.broadcast %12 : vector<8x1xi32> to vector<8x32xi32>
    %15 = arith.cmpi eq, %11, %14 : vector<8x32xi32>
    %cst_7 = arith.constant 0.000000e+00 : f32
    %16 = vector.broadcast %cst_7 : f32 to vector<8x32xf32>
    %17 = arith.select %15, %10, %16 : vector<8x32xi1>, vector<8x32xf32>
    %cst_8 = arith.constant dense<0.000000e+00> : vector<8xf32>
    %18 = vector.multi_reduction <add>, %17, %cst_8 [1] : vector<8x32xf32> to vector<8xf32>
    %19 = vector.shape_cast %18 : vector<8xf32> to vector<8x1xf32>
    %20 = vector.broadcast %13 : vector<8x1xi32> to vector<8x32xi32>
    %21 = arith.cmpi eq, %11, %20 : vector<8x32xi32>
    %cst_9 = arith.constant 0.000000e+00 : f32
    %22 = vector.broadcast %cst_9 : f32 to vector<8x32xf32>
    %23 = arith.select %21, %10, %22 : vector<8x32xi1>, vector<8x32xf32>
    %cst_10 = arith.constant dense<0.000000e+00> : vector<8xf32>
    %24 = vector.multi_reduction <add>, %23, %cst_10 [1] : vector<8x32xf32> to vector<8xf32>
    %25 = vector.shape_cast %24 : vector<8xf32> to vector<8x1xf32>
    %c0_11 = arith.constant 0 : index
    %c0_12 = arith.constant 0 : index
    %26 = memref.load %arg1[%c0_11, %c0_12] : memref<1x1xf32, #tpu.memory_space<smem>>
    %27 = vector.broadcast %26 : f32 to vector<8x1xf32>
    %28 = arith.mulf %27, %19 : vector<8x1xf32>
    %cst_13 = arith.constant 1.000000e+00 : f32
    %29 = arith.subf %cst_13, %26 : f32
    %30 = vector.broadcast %29 : f32 to vector<8x1xf32>
    %31 = arith.mulf %30, %25 : vector<8x1xf32>
    %32 = arith.addf %28, %31 : vector<8x1xf32>
    %33 = tpu.iota {dimensions = array<i32: 0>} : vector<8x1xi32>
    %c8_i32 = arith.constant 8 : i32
    %34 = arith.muli %arg0, %c8_i32 : i32
    %35 = vector.broadcast %34 : i32 to vector<8x1xi32>
    %36 = arith.addi %33, %35 : vector<8x1xi32>
    %c20_i32 = arith.constant 20 : i32
    %37 = vector.broadcast %c20_i32 : i32 to vector<8x1xi32>
    %38 = arith.cmpi slt, %36, %37 : vector<8x1xi32>
    %39 = arith.subf %9, %32 : vector<8x1xf32>
    %cst_14 = arith.constant 0.000000e+00 : f32
    %40 = vector.broadcast %cst_14 : f32 to vector<8x1xf32>
    %41 = arith.select %38, %39, %40 : vector<8x1xi1>, vector<8x1xf32>
    %42 = vector.shape_cast %41 : vector<8x1xf32> to vector<1x8x1xf32>
    %cst_15 = arith.constant dense<0.000000e+00> : vector<1xf32>
    %43 = vector.multi_reduction <add>, %42, %cst_15 [1, 2] : vector<1x8x1xf32> to vector<1xf32>
    %44 = vector.shape_cast %43 : vector<1xf32> to vector<1x1x1xf32>
    %45 = vector.extract %44[0, 0, 0] : f32 from vector<1x1x1xf32>
    %46 = vector.broadcast %45 : f32 to vector<8x128xf32>
    %c0_16 = arith.constant 0 : index
    %c0_17 = arith.constant 0 : index
    %47 = vector.load %arg4[%c0_16, %c0_17] : memref<8x128xf32, #tpu.memory_space<vmem>>, vector<8x128xf32>
    tpu.vector_store %arg4[%c0_16, %c0_17], %46 {strides = array<i32>} : memref<8x128xf32, #tpu.memory_space<vmem>>, vector<8x128xf32>,
    return
  }
  func.func @transform_0(%arg0: i32) -> (i32, i32) {
    %c0_i32 = arith.constant 0 : i32
    %c0_i32_0 = arith.constant 0 : i32
    %c0_i32_1 = arith.constant 0 : i32
    return %c0_i32, %c0_i32_0 : i32, i32
  }
  func.func @transform_1(%arg0: i32) -> (i32, i32) {
    %c0_i32 = arith.constant 0 : i32
    %c0_i32_0 = arith.constant 0 : i32
    return %arg0, %c0_i32 : i32, i32
  }
  func.func @transform_2(%arg0: i32) -> (i32, i32) {
    %c0_i32 = arith.constant 0 : i32
    %c0_i32_0 = arith.constant 0 : i32
    return %arg0, %c0_i32 : i32, i32
  }
  func.func @transform_3(%arg0: i32) -> (i32, i32) {
    %c0_i32 = arith.constant 0 : i32
    %c0_i32_0 = arith.constant 0 : i32
    return %arg0, %c0_i32 : i32, i32
  }
}

</mosaic_0001>

<bundles_post_ra>
// kernel: tpu_custom_call.1
= control target key start
LH: loop header
LB: loop body
LE: loop exit
PB: predicated region body
PF: predicated region fallthrough
CT: control target
= control target key end

     0   :  { %s579_s0 = inlined_call_operand.<no memory space> [shape: f32[1,1], index: 0, kind: input, shape index: {}]   ;;  %s580_s1 = inlined_call_operand.vmem [shape: f32[20,32], index: 1, kind: input, shape index: {}]   ;;  %s581_s2 = inlined_call_operand.vmem [shape: s32[20,2], index: 2, kind: input, shape index: {}]   ;;  %s582_s3 = inlined_call_operand.hbm [shape: f32[24,128], index: 3, kind: output, shape index: {}]  }
   0x1   :  { %8 = sst [smem:[#allocation2]] %s579_s0 }
   0x2   :  { %9 = vsyncpa [#allocation4], 0 }
   0x3   :  { %11 = vsyncpa [#allocation4 + $0x1], 0  ;;  %s483_s14 = smov 0   ;;  %s485_s15 = smov 0  }
   0x4   :  { %s487_s16 = smov 0   ;;  %s489_s17 = smov 0  }
   0x5 LB: > { %s504_s0 = sadd.s32 4294967295, %s456_s17   ;;  %s332_s18 = sadd.s32 4294967294, %s456_s17   ;;  %s456_s17 = sphi %s489_s17, %s588_s17   ;;  %s452_s16 = sphi %s487_s16, %s587_s16   ;;  %s448_s15 = sphi %s485_s15, %s586_s15   ;;  %s444_s14 = sphi %s483_s14, %s585_s14  }
   0x6   : > { %s508_s19 = sadd.s32 1, %s456_s17   ;;  %s97_s20 = sadd.s32 1, %s452_s16 }
   0x7   : > { %s94_s21 = ssub.s32 %s456_s17, %s508_s19  ;;  %p107_p0 = scmp.ne.s32.totalorder %s452_s16, %s448_s15 }
   0x8   : > { %p95_p1 = scmp.eq.s32.totalorder %s94_s21, 0  ;;  %p108_p2 = scmp.eq.s32.totalorder %s504_s0, 2 }
   0x9   : > { %p113_p3 = scmp.ne.s32.totalorder %s448_s15, %s444_s14  ;;  %p114_p4 = scmp.eq.s32.totalorder %s332_s18, 2 }
   0xa   : > { %s519_s22 = scalar_select %p95_p1, %s452_s16, %s97_s20  }
   0xb   : > { %p521_p5 = por %p108_p2, %p107_p0  ;;  %p525_p6 = por %p114_p4, %p113_p3 }
   0xc   : > { %p335_p7 = scmp.ge.s32.totalorder %s456_s17, 1  ;;  %p149_p8 = scmp.lt.s32.totalorder %s456_s17, 4 }
   0xe   : > { %p150_p9 = pnand %p335_p7, %p149_p8 }
   0xf   : > { %p176_p10 = scmp.lt.s32.totalorder (!%p150_p9), %s504_s0, 2  ;;  %s217_s6 = sld [smem:[#allocation2]] (!%p150_p9) }
  0x10   : > { %153 = sbr.rel (%p150_p9) target bundleno = 479 (0x1df), region = 32  ;;  %s339_s8 = sshll.u32 (!%p150_p9), %s504_s0, 3 }
  0x11   : > { %s173_s9 = sand.u32 (!%p150_p9), 1, %s448_s15   ;;  %s256_s13 = scalar_lea.hbm (!%p150_p9), %s582_s3, %s339_s8 }
  0x12   : > { %s336_s10 = sshll.u32 (!%p150_p9), %s173_s9, 3  ;;  %s260_s21 = sshll.u32 (!%p150_p9), %s256_s13, 4  ;;  %s261_s21 = int_to_ptr.hbm [resolvable:$true] %s260_s21 }
  0x13   : > { %s175_s18 = scalar_lea.vmem (!%p150_p9), [#allocation3], %s336_s10  ;;  %s408_s27 = sshra.s32 (!%p150_p9), %s261_s21, 4  ;;  %s409_s27 = int_to_ptr.hbm [resolvable:$true] %s408_s27 }
  0x14   : > { %s258_s20 = sshll.u32 (!%p150_p9), %s175_s18, 4  ;;  %s410_s28 = scalar_lea.hbm (!%p150_p9), %s409_s27, 8  ;;  %s259_s20 = int_to_ptr.vmem [resolvable:$true] %s258_s20 }
  0x15   : > { %v458_v0 = vmov 0   ;;  %v459_v1 = vmov 1   ;;  %s177_s25 = scalar_select %p176_p10, %s504_s0, 2  ;;  %vm185_vm0 = vcmask 261120   ;;  %v198_v10 = vlaneseq }
  0x16   : > { %387 = vset.pattern.permute.xlu0 %v458_v0  ;;  %388 = vset.pattern.permute.xlu1 %v459_v1  ;;  %s220_s7 = ssub.f32 1.0, %s217_s6  ;;  %v227_v22 = vstv %s339_s8  ;;  %v218_v23 = vstv %s217_s6  ;;  %vm232_vm4 = vcmask 7168   ;;  %p411_p11 = scmp.ne.s32.totalorder %s409_s27, %s410_s28 }
  0x17   : > { %s337_s26 = sshll.u32 %s177_s25, 3  ;;  %v199_v11 = vand.u32 127, %v198_v10  ;;  %v225_v21 = vshrl.u32 %v198_v10, 7  ;;  %s414_s30 = scalar_lea.hbm %s582_s3, 24 }
  0x18   : > { %s179_s29 = scalar_lea.vmem %s580_s1, %s337_s26  ;;  %s183_s5 = scalar_lea.vmem %s581_s2, %s337_s26  ;;  %v221_v24 = vstv %s220_s7 }
  0x19   : > { %v184_v2 = vld [vmem:[%s179_s29] sm:$0xff]  ;;  %v228_v27 = vadd.s32 %v227_v22, %v225_v21  ;;  %s246_s26 = scalar_lea.sflag [#allocation4], %s173_s9  ;;  %p412_p12 = pnand %p411_p11, %p521_p5 }
  0x1a   : > { %v200_v3 = vld [vmem:[%s183_s5] sm:$0xff]  ;;  %v186_v4 = vsel %vm185_vm0, %v184_v2, -inf  ;;  %p415_p0 = scmp.lt.s32.totalorder %s409_s27, %s582_s3  ;;  %p416_p1 = scmp.lt.s32.totalorder %s414_s30, %s410_s28 }
  0x1b   : > { %210 = vperm.xlu1 %388, %v200_v3   ;;  %187 = vmax.xlane.f32.xlu0 %v186_v4  ;;  %vm229_vm3 = vcmp.lt.s32.totalorder %v228_v27, 20  ;;  %p413_p13 = pneg %p412_p12 }
  0x1c   : > { %p417_p2 = por %p416_p1, %p415_p0 }
  0x1e   : > { %p418_p3 = pnand %p417_p2, %p413_p13 }
  0x2f   : > { %202 = vperm.xlu0 %387, %v200_v3  }
  0x37   : > { %389 = vset.pattern.permute.xlu0 %v459_v1 }
  0x8d   : > { %v211_v13 = vpop.permute.xlu1 %210 }
  0x8e   : > { %v188_v5 = vpop.xlane.xlu0 %187  ;;  %vm212_vm2 = vcmp.eq.s32.totalorder %v199_v11, %v211_v13 }
  0x8f   : > { %v189_v6 = vsub.f32 %v184_v2, %v188_v5  ;;  %v213_v16 = vsel %vm212_vm2, %v184_v2, 0.0 }
  0x90   : > { %v214_v17 = vsel %vm185_vm0, %v213_v16, 0.0 }
  0x91   : > { %v190_v7 = vmul.f32 1.442695, %v189_v6 }
  0x93   : > { %390 = vpow2.f32 %v190_v7 }
  0x99   : > { %v391_v8 = vpop.eup %390 }
  0x9a   : > { %v192_v9 = vsel %vm185_vm0, %v391_v8, 0.0 }
  0x9b   : > { %193 = vadd.xlane.f32.xlu1 %v192_v9 }
  0xa1   : > { %v203_v12 = vpop.permute.xlu0 %202 }
  0xa2   : > { %vm204_vm1 = vcmp.eq.s32.totalorder %v199_v11, %v203_v12 }
  0xa3   : > { %v205_v14 = vsel %vm204_vm1, %v184_v2, 0.0 }
  0xa4   : > { %v206_v15 = vsel %vm185_vm0, %v205_v14, 0.0 }
  0xa5   : > { %207 = vadd.xlane.f32.xlu2 %v206_v15 }
  0xad   : > { %215 = vadd.xlane.f32.xlu2 %v214_v17 }
 0x10e   : > { %v194_v18 = vpop.xlane.xlu1 %193 }
 0x10f   : > { %392 = vlog2.f32 %v194_v18 }
 0x115   : > { %v393_v20 = vpop.eup %392 }
 0x116   : > { %v196_v25 = vmul.f32 0.6931472, %v393_v20 }
 0x118   : > { %v208_v19 = vpop.xlane.xlu2 %207  ;;  %v197_v30 = vadd.f32 %v196_v25, %v188_v5 }
 0x119   : > { %v219_v28 = vmul.f32 %v218_v23, %v208_v19 }
 0x120   : > { %v216_v26 = vpop.xlane.xlu2 %215 }
 0x121   : > { %v222_v29 = vmul.f32 %v221_v24, %v216_v26 }
 0x123   : > { %v223_v31 = vadd.f32 %v222_v29, %v219_v28 }
 0x125   : > { %v230_v32 = vsub.f32 %v197_v30, %v223_v31 }
 0x127   : > { %v231_v33 = vsel %vm229_vm3, %v230_v32, 0.0 }
 0x128   : > { %v233_v34 = vsel %vm232_vm4, %v231_v33, 0.0 }
 0x129   : > { %234 = vadd.xlane.f32.xlu2 %v233_v34 }
 0x19c   : > { %v235_v35 = vpop.xlane.xlu2 %234 }
 0x19d   : > { %v236_v36 = vrot.slane %v235_v35, 4 }
 0x19f   : > { %v237_v37 = vadd.f32 %v236_v36, %v235_v35 }
 0x1a1   : > { %v238_v38 = vrot.slane %v237_v37, 2 }
 0x1a3   : > { %v239_v39 = vadd.f32 %v238_v38, %v237_v37 }
 0x1a5   : > { %v240_v40 = vrot.slane %v239_v39, 1 }
 0x1a7   : > { %v241_v41 = vadd.f32 %v240_v40, %v239_v39 }
 0x1a9   : > { %344 = vpush %v241_v41 }
 0x1da   : > { %s345_s25 = spop %344 }
 0x1db   : > { %v243_v42 = vstv %s345_s25 }
 0x1dc   : > { %244 = vst [vmem:[%s175_s18] sm:$0xff] %v243_v42 }
 0x1dd   : > { %421 = shalt.err (!%p418_p3)
}
 0x1de   : > { %346 = dma.vmem_to_hbm [thread:$0]  (%p521_p5), %s259_s20, 128, %s261_s21, %s246_s26  }
 0x1df PF: > { %p352_p4 = scmp.ge.s32.totalorder %s456_s17, 2  ;;  %s272_s6 = sand.u32 1, %s444_s14  }
 0x1e0   : > { %s273_s7 = scalar_lea.sflag [#allocation4], %s272_s6 }
 0x1e1   : > { %p349_p7 = pnand %p352_p4, %p525_p6 }
 0x1e3   : > { %p350_p8 = pneg %p349_p7 }
 0x1e5   : > { %439 = dma.done.wait (%p350_p8), %s273_s7, 128  }
 0x1e6   : > { %441 = vsyncadd (%p350_p8), %s273_s7, 4294967168  ;;  %p14_p9 = scmp.ge.s32.totalorder %s508_s19, 5   ;;  %s585_s14 = smov %s448_s15 }
 0x1e7   : > { %s586_s15 = smov %s452_s16  ;;  %s587_s16 = smov %s519_s22 }
 0x1e8   : > { %s588_s17 = smov %s508_s19  ;;  %16 = sbr.rel (!%p14_p9) target bundleno = 5 (0x5), region = 70 }
 0x1ed   :  { %279 = vsyncpa [#allocation4], 1 }
 0x1ee   :  { %281 = vsyncpa [#allocation4 + $0x1], 1 }

</bundles_post_ra>
